<compile_context>
chip_gen: v6e
topology: v6e:2x2x1
jax: 0.10.0
libtpu: 0.0.40
codegen_flags: <defaults>
</compile_context>

<pallas_src>
import functools
import math

import jax
import jax.numpy as jnp
from jax.experimental import pallas as pl
from jax.experimental.pallas import tpu as pltpu


def _round_up(x: int, m: int) -> int:
    return (x + m - 1) // m * m


def _largest_divisor_leq(n: int, cap: int) -> int:
    for d in range(min(n, cap), 0, -1):
        if n % d == 0:
            return d
    return 1


# --------------------------------------------------------------------------
# Kernel 1: stacked linear projections.
#   One launch computes y_i = x_i @ W_i + b_i for i in 0..n-1 (q/k/pos/neg).
# --------------------------------------------------------------------------
def _stacked_linear_kernel(x_ref, w_ref, b_ref, o_ref):
    # x_ref: (1, tr, Cin), w_ref: (1, Cin, Cout), b_ref: (1, 1, Cout)
    y = jnp.dot(x_ref[0], w_ref[0], preferred_element_type=jnp.float32)
    o_ref[0] = (y + b_ref[0]).astype(o_ref.dtype)


def stacked_linear_pallas(xs, wbs, *, tile_m=512):
    """xs: list of (Mi, Cin); wbs: list of (W (Cin, Cout), b (Cout,)).
    Returns list of (Mi, Cout), all computed in ONE pallas_call."""
    n = len(xs)
    Cin = xs[0].shape[1]
    Cout = wbs[0][0].shape[1]

    R = _round_up(max(x.shape[0] for x in xs), 8)
    tr = min(tile_m, R)
    Rp = _round_up(R, tr)

    x_all = jnp.stack([jnp.pad(x, ((0, Rp - x.shape[0]), (0, 0))) for x in xs])
    w_all = jnp.stack([w for (w, _) in wbs])
    b_all = jnp.stack([b.reshape(1, Cout) for (_, b) in wbs])

    out = pl.pallas_call(
        _stacked_linear_kernel,
        out_shape=jax.ShapeDtypeStruct((n, Rp, Cout), x_all.dtype),
        grid_spec=pltpu.PrefetchScalarGridSpec(
            num_scalar_prefetch=0,
            grid=(n, Rp // tr),
            in_specs=[
                pl.BlockSpec((1, tr, Cin), lambda i, j: (i, j, 0)),   # x row tile
                pl.BlockSpec((1, Cin, Cout), lambda i, j: (i, 0, 0)),  # W_i
                pl.BlockSpec((1, 1, Cout), lambda i, j: (i, 0, 0)),    # b_i
            ],
            out_specs=pl.BlockSpec((1, tr, Cout), lambda i, j: (i, j, 0)),
        ),
        compiler_params=pltpu.CompilerParams(
            dimension_semantics=("parallel", "parallel")),
    )(x_all, w_all, b_all)
    return [out[i, :x.shape[0]] for i, x in enumerate(xs)]


# --------------------------------------------------------------------------
# Kernel 2 (also used for the fused out_proj): y = x @ W + b, rows tiled,
# weight fully resident in VMEM.
# --------------------------------------------------------------------------
def _linear_kernel(x_ref, w_ref, b_ref, o_ref):
    y = jnp.dot(x_ref[...], w_ref[...], preferred_element_type=jnp.float32)
    o_ref[...] = (y + b_ref[...]).astype(o_ref.dtype)


def linear_pallas(x2d, w, b, *, tile_m=512):
    M, Cin = x2d.shape
    Cout = w.shape[1]
    tile_m = min(tile_m, _round_up(M, 8))
    Mp = _round_up(M, tile_m)
    if Mp != M:
        x2d = jnp.pad(x2d, ((0, Mp - M), (0, 0)))
    b2d = b.reshape(1, Cout)

    out = pl.pallas_call(
        _linear_kernel,
        out_shape=jax.ShapeDtypeStruct((Mp, Cout), x2d.dtype),
        grid_spec=pltpu.PrefetchScalarGridSpec(
            num_scalar_prefetch=0,
            grid=(Mp // tile_m,),
            in_specs=[
                pl.BlockSpec((tile_m, Cin), lambda i: (i, 0)),  # x row tile
                pl.BlockSpec((Cin, Cout), lambda i: (0, 0)),    # W (resident)
                pl.BlockSpec((1, Cout), lambda i: (0, 0)),      # b (resident)
            ],
            out_specs=pl.BlockSpec((tile_m, Cout), lambda i: (i, 0)),
        ),
        compiler_params=pltpu.CompilerParams(
            dimension_semantics=("parallel",)),
    )(x2d, w, b2d)
    return out[:M]


# --------------------------------------------------------------------------
# Kernel 3: dual-value attention core.  softmax(q k^T * scale) computed once
# and applied to BOTH value streams, gridded over batch*head tiles.
# --------------------------------------------------------------------------
def _dual_attn_kernel(q_ref, k_ref, vp_ref, vn_ref, op_ref, on_ref, *, scale):
    q = q_ref[...].astype(jnp.float32) * scale   # (T, Nq, dh)
    k = k_ref[...].astype(jnp.float32)           # (T, Nk, dh)
    s = jnp.einsum("bqd,bkd->bqk", q, k, preferred_element_type=jnp.float32)
    s_max = jnp.max(s, axis=-1, keepdims=True)
    p = jnp.exp(s - s_max)
    p = p / jnp.sum(p, axis=-1, keepdims=True)
    op_ref[...] = jnp.einsum("bqk,bkd->bqd", p, vp_ref[...].astype(jnp.float32),
                             preferred_element_type=jnp.float32).astype(op_ref.dtype)
    on_ref[...] = jnp.einsum("bqk,bkd->bqd", p, vn_ref[...].astype(jnp.float32),
                             preferred_element_type=jnp.float32).astype(on_ref.dtype)


def dual_attention_pallas(q_h, k_h, vp_h, vn_h, *, scale, tile_bh=64):
    """q_h: (BH, Nq, dh); k_h/vp_h/vn_h: (BH, Nk, dh) -> two (BH, Nq, dh)."""
    BH, Nq, dh = q_h.shape
    _, Nk, _ = k_h.shape
    t = _largest_divisor_leq(BH, tile_bh)

    return pl.pallas_call(
        functools.partial(_dual_attn_kernel, scale=scale),
        out_shape=(jax.ShapeDtypeStruct((BH, Nq, dh), q_h.dtype),
                   jax.ShapeDtypeStruct((BH, Nq, dh), q_h.dtype)),
        grid_spec=pltpu.PrefetchScalarGridSpec(
            num_scalar_prefetch=0,
            grid=(BH // t,),
            in_specs=[
                pl.BlockSpec((t, Nq, dh), lambda i: (i, 0, 0)),
                pl.BlockSpec((t, Nk, dh), lambda i: (i, 0, 0)),
                pl.BlockSpec((t, Nk, dh), lambda i: (i, 0, 0)),
                pl.BlockSpec((t, Nk, dh), lambda i: (i, 0, 0)),
            ],
            out_specs=[pl.BlockSpec((t, Nq, dh), lambda i: (i, 0, 0)),
                       pl.BlockSpec((t, Nq, dh), lambda i: (i, 0, 0))],
        ),
        compiler_params=pltpu.CompilerParams(
            dimension_semantics=("parallel",)),
    )(q_h, k_h, vp_h, vn_h)


# --------------------------------------------------------------------------
# Full module forward (matches Attention_Malignancy.forward)
# --------------------------------------------------------------------------
def attention_malignancy_forward(q, k, v_pos, v_neg, params, num_heads):
    B, Nq, C = q.shape
    _, Nk, _ = k.shape
    Ci = params["q_proj"][0].shape[1]
    dh = Ci // num_heads
    scale = 1.0 / math.sqrt(dh)

    have_pos = v_pos is not None
    have_neg = v_neg is not None
    if not have_pos and not have_neg:
        return None, None

    # If one stream is missing we reuse the other (result discarded) to keep a
    # single dual-value kernel; the common path has both streams present.
    vp_in, vp_par = (v_pos, params["pos_proj"]) if have_pos else (v_neg, params["neg_proj"])
    vn_in, vn_par = (v_neg, params["neg_proj"]) if have_neg else (v_pos, params["pos_proj"])

    # All four input projections in one pallas_call.
    qp, kp, vpp, vnp = stacked_linear_pallas(
        [q.reshape(B * Nq, C), k.reshape(B * Nk, C),
         vp_in.reshape(B * Nk, C), vn_in.reshape(B * Nk, C)],
        [params["q_proj"], params["k_proj"], vp_par, vn_par])

    def sep(x2d, n_tok):
        # (B*n, Ci) -> (B*H, n, dh)   (layout plumbing, done outside kernels)
        return (x2d.reshape(B, n_tok, num_heads, dh)
                   .transpose(0, 2, 1, 3)
                   .reshape(B * num_heads, n_tok, dh))

    q_h = sep(qp, Nq)
    k_h = sep(kp, Nk)
    vp_h = sep(vpp, Nk)
    vn_h = sep(vnp, Nk)

    out_p_h, out_n_h = dual_attention_pallas(q_h, k_h, vp_h, vn_h, scale=scale)

    def recombine(x):
        # (B*H, Nq, dh) -> (B*Nq, Ci)
        return (x.reshape(B, num_heads, Nq, dh)
                 .transpose(0, 2, 1, 3)
                 .reshape(B * Nq, Ci))

    # Fuse both out_proj applications into one call (weights DMA'd once).
    both = jnp.concatenate([recombine(out_p_h), recombine(out_n_h)], axis=0)
    both = linear_pallas(both, *params["out_proj"]).reshape(2, B, Nq, C)
    out_pos = both[0] if have_pos else None
    out_neg = both[1] if have_neg else None
    return out_pos, out_neg


# --------------------------------------------------------------------------
# Pure-JAX reference (mirrors the PyTorch module)
# --------------------------------------------------------------------------
def reference_forward(q, k, v_pos, v_neg, params, num_heads):
    hp = jax.lax.Precision.HIGHEST

    def lin(x, wb):
        w, b = wb
        return jnp.dot(x, w, precision=hp) + b

    def sep(x):
        b, n, c = x.shape
        return x.reshape(b, n, num_heads, c // num_heads).transpose(0, 2, 1, 3)

    qq = sep(lin(q, params["q_proj"]))
    kk = sep(lin(k, params["k_proj"]))
    dh = qq.shape[-1]
    attn = jnp.einsum("bhqd,bhkd->bhqk", qq, kk, precision=hp) / math.sqrt(dh)
    attn = jax.nn.softmax(attn, axis=-1)

    def branch(v, name):
        vv = sep(lin(v, params[name]))
        o = jnp.einsum("bhqk,bhkd->bhqd", attn, vv, precision=hp)
        b, h, n, d = o.shape
        o = o.transpose(0, 2, 1, 3).reshape(b, n, h * d)
        return lin(o, params["out_proj"])

    out_pos = branch(v_pos, "pos_proj") if v_pos is not None else None
    out_neg = branch(v_neg, "neg_proj") if v_neg is not None else None
    return out_pos, out_neg


if __name__ == "__main__":
    # Small shapes, but lane-dense channel dims (multiples of 128).
    B, Nq, Nk = 2, 8, 16
    embedding_dim, num_heads, downsample_rate = 256, 8, 2
    internal_dim = embedding_dim // downsample_rate  # 128

    key = jax.random.PRNGKey(0)
    ks = jax.random.split(key, 14)

    q = jax.random.normal(ks[0], (B, Nq, embedding_dim), jnp.float32)
    k = jax.random.normal(ks[1], (B, Nk, embedding_dim), jnp.float32)
    v_pos = jax.random.normal(ks[2], (B, Nk, embedding_dim), jnp.float32)
    v_neg = jax.random.normal(ks[3], (B, Nk, embedding_dim), jnp.float32)

    def init_linear(kw, kb, cin, cout):
        bound = 1.0 / math.sqrt(cin)  # PyTorch nn.Linear-style init bounds
        w = jax.random.uniform(kw, (cin, cout), jnp.float32, -bound, bound)
        b = jax.random.uniform(kb, (cout,), jnp.float32, -bound, bound)
        return (w, b)

    params = {
        "q_proj":   init_linear(ks[4],  ks[5],  embedding_dim, internal_dim),
        "k_proj":   init_linear(ks[6],  ks[7],  embedding_dim, internal_dim),
        "pos_proj": init_linear(ks[8],  ks[9],  embedding_dim, internal_dim),
        "neg_proj": init_linear(ks[10], ks[11], embedding_dim, internal_dim),
        "out_proj": init_linear(ks[12], ks[13], internal_dim, embedding_dim),
    }

    out_pos, out_neg = attention_malignancy_forward(q, k, v_pos, v_neg, params, num_heads)
    out_pos = jax.block_until_ready(out_pos)
    out_neg = jax.block_until_ready(out_neg)

    ref_pos, ref_neg = reference_forward(q, k, v_pos, v_neg, params, num_heads)
    assert out_pos.shape == (B, Nq, embedding_dim)
    assert out_neg.shape == (B, Nq, embedding_dim)
    assert jnp.allclose(out_pos, ref_pos, atol=1e-3, rtol=1e-3), "out_pos mismatch"
    assert jnp.allclose(out_neg, ref_neg, atol=1e-3, rtol=1e-3), "out_neg mismatch"

    print("KERNEL_OK")
</pallas_src>

<mosaic_0001>
module attributes {stable_mosaic.version = 11 : i64} {
  func.func @_stacked_linear_kernel(%arg0: i32, %arg1: i32, %arg2: memref<1x32x256xf32, #tpu.memory_space<vmem>>, %arg3: memref<1x256x128xf32, #tpu.memory_space<vmem>>, %arg4: memref<1x1x128xf32, #tpu.memory_space<vmem>>, %arg5: memref<1x32x128xf32, #tpu.memory_space<vmem>>) attributes {dimension_semantics = [#tpu.dimension_semantics<parallel>, #tpu.dimension_semantics<parallel>], iteration_bounds = array<i64: 4, 1>, scalar_prefetch = 0 : i64, scratch_operands = 0 : i64, tpu.core_type = #tpu.core_type<tc>, window_params = [{transform_indices = @transform_0, window_bounds = array<i64: 1, 32, 256>}, {transform_indices = @transform_1, window_bounds = array<i64: 1, 256, 128>}, {transform_indices = @transform_2, window_bounds = array<i64: 1, 1, 128>}, {transform_indices = @transform_3, window_bounds = array<i64: 1, 32, 128>}]} {
    %c0 = arith.constant 0 : index
    %c0_0 = arith.constant 0 : index
    %c0_1 = arith.constant 0 : index
    %0 = vector.load %arg2[%c0, %c0_0, %c0_1] : memref<1x32x256xf32, #tpu.memory_space<vmem>>, vector<1x32x256xf32>
    %1 = vector.shape_cast %0 : vector<1x32x256xf32> to vector<32x256xf32>
    %c0_2 = arith.constant 0 : index
    %c0_3 = arith.constant 0 : index
    %c0_4 = arith.constant 0 : index
    %2 = vector.load %arg3[%c0_2, %c0_3, %c0_4] : memref<1x256x128xf32, #tpu.memory_space<vmem>>, vector<1x256x128xf32>
    %3 = vector.shape_cast %2 : vector<1x256x128xf32> to vector<256x128xf32>
    %cst = arith.constant dense<0.000000e+00> : vector<32x128xf32>
    %4 = tpu.matmul %1, %3, %cst {dimension_numbers = #tpu.dot_dimension_numbers<[1], [0], [0], [1], [0, 0, 1, 1], [], []>} : vector<32x256xf32>, vector<256x128xf32>, vector<32x128xf32> -> vector<32x128xf32>
    %c0_5 = arith.constant 0 : index
    %c0_6 = arith.constant 0 : index
    %c0_7 = arith.constant 0 : index
    %5 = vector.load %arg4[%c0_5, %c0_6, %c0_7] : memref<1x1x128xf32, #tpu.memory_space<vmem>>, vector<1x1x128xf32>
    %6 = vector.shape_cast %5 : vector<1x1x128xf32> to vector<1x128xf32>
    %7 = vector.broadcast %6 : vector<1x128xf32> to vector<32x128xf32>
    %8 = arith.addf %4, %7 : vector<32x128xf32>
    %c0_8 = arith.constant 0 : index
    %c0_9 = arith.constant 0 : index
    %c0_10 = arith.constant 0 : index
    %9 = vector.load %arg5[%c0_8, %c0_9, %c0_10] : memref<1x32x128xf32, #tpu.memory_space<vmem>>, vector<1x32x128xf32>
    %10 = vector.shape_cast %9 : vector<1x32x128xf32> to vector<32x128xf32>
    %11 = vector.shape_cast %8 : vector<32x128xf32> to vector<1x32x128xf32>
    tpu.vector_store %arg5[%c0_8, %c0_9, %c0_10], %11 {strides = array<i32>} : memref<1x32x128xf32, #tpu.memory_space<vmem>>, vector<1x32x128xf32>,
    return
  }
  func.func @transform_0(%arg0: i32, %arg1: i32) -> (i32, i32, i32) {
    %c0_i32 = arith.constant 0 : i32
    %c0_i32_0 = arith.constant 0 : i32
    return %arg0, %arg1, %c0_i32 : i32, i32, i32
  }
  func.func @transform_1(%arg0: i32, %arg1: i32) -> (i32, i32, i32) {
    %c0_i32 = arith.constant 0 : i32
    %c0_i32_0 = arith.constant 0 : i32
    %c0_i32_1 = arith.constant 0 : i32
    return %arg0, %c0_i32, %c0_i32_0 : i32, i32, i32
  }
  func.func @transform_2(%arg0: i32, %arg1: i32) -> (i32, i32, i32) {
    %c0_i32 = arith.constant 0 : i32
    %c0_i32_0 = arith.constant 0 : i32
    %c0_i32_1 = arith.constant 0 : i32
    return %arg0, %c0_i32, %c0_i32_0 : i32, i32, i32
  }
  func.func @transform_3(%arg0: i32, %arg1: i32) -> (i32, i32, i32) {
    %c0_i32 = arith.constant 0 : i32
    %c0_i32_0 = arith.constant 0 : i32
    return %arg0, %arg1, %c0_i32 : i32, i32, i32
  }
}

</mosaic_0001>

<bundles_post_ra>
// kernel: tpu_custom_call.1
= control target key start
LH: loop header
LB: loop body
LE: loop exit
PB: predicated region body
PF: predicated region fallthrough
CT: control target
= control target key end

     0   :  { %s1174_s0 = inlined_call_operand.hbm [shape: f32[4,32,256], index: 0, kind: input, shape index: {}]   ;;  %s1175_s1 = inlined_call_operand.hbm [shape: f32[4,256,128], index: 1, kind: input, shape index: {}]   ;;  %s1176_s2 = inlined_call_operand.hbm [shape: f32[4,1,128], index: 2, kind: input, shape index: {}]   ;;  %s1177_s3 = inlined_call_operand.hbm [shape: f32[4,32,128], index: 3, kind: output, shape index: {}]  }
   0x1   :  { %1179 = sst [smem:[#allocation14_spill]] %s1174_s0 }
   0x2   :  { %1180 = sst [smem:[#allocation15_spill]] %s1175_s1 }
   0x3   :  { %8 = vsyncpa [#allocation3], 0 }
   0x4   :  { %10 = vsyncpa [#allocation3 + $0x1], 0 }
   0x5   :  { %11 = vsyncpa [#allocation6], 0 }
   0x6   :  { %13 = vsyncpa [#allocation6 + $0x1], 0 }
   0x7   :  { %14 = vsyncpa [#allocation4], 0 }
   0x8   :  { %16 = vsyncpa [#allocation4 + $0x1], 0  ;;  %s938_s12 = smov 0   ;;  %s940_s13 = smov 0  }
   0x9   :  { %s942_s14 = smov 0   ;;  %s944_s15 = smov 0  }
   0xa   :  { %s946_s16 = smov 0   ;;  %s948_s17 = smov 0  }
   0xb LB: > { %s969_s18 = sadd.s32 4294967295, %s906_s17   ;;  %s561_s19 = sadd.s32 4294967294, %s906_s17   ;;  %s906_s17 = sphi %s948_s17, %s22_s17   ;;  %s902_s16 = sphi %s946_s16, %s1197_s16   ;;  %s898_s15 = sphi %s944_s15, %s1196_s15   ;;  %s894_s14 = sphi %s942_s14, %s1195_s14   ;;  %s890_s13 = sphi %s940_s13, %s1194_s13   ;;  %s886_s12 = sphi %s938_s12, %s1193_s12  }
   0xc   : > { %s34_s20 = sadd.s32 1, %s902_s16  ;;  %s43_s21 = sadd.s32 1, %s894_s14 }
   0xd   : > { %p36_p0 = scmp.ge.s32.totalorder %s34_s20, 4  ;;  %p50_p1 = scmp.ne.s32.totalorder %s894_s14, %s890_s13 }
   0xe   : > { %p51_p2 = scmp.eq.s32.totalorder %s906_s17, 0  ;;  %p56_p3 = scmp.ne.s32.totalorder %s890_s13, %s886_s12 }
   0xf   : > { %s1199_s20 = smov (%p36_p0, %s34_s20), 0  ;;  %p57_p5 = scmp.eq.s32.totalorder %s969_s18, 0 }
  0x10   : > { %1181 = sst [smem:[#allocation12_spill]] %s1199_s20  ;;  %p981_p4 = por %p51_p2, %p50_p1 }
  0x11   : > { %s38_s23 = ssub.s32 %s902_s16, %s1199_s20  ;;  %p134_p6 = scmp.eq.s32.totalorder %s969_s18, 3 }
  0x12   : > { %p41_p7 = scmp.eq.s32.totalorder %s38_s23, 0  ;;  %p989_p8 = por %p57_p5, %p56_p3 }
  0x13   : > { %p993_p9 = por %p134_p6, %p50_p1  ;;  %p140_p10 = scmp.eq.s32.totalorder %s561_s19, 3 }
  0x14   : > { %s998_s26 = scalar_select %p41_p7, %s894_s14, %s43_s21  }
  0x15   : > { %p1000_p11 = por %p140_p10, %p56_p3  ;;  %p682_p12 = scmp.lt.s32.totalorder %s906_s17, 4 }
  0x16   : > { %1185 = sst [smem:[#allocation13_spill]] %s998_s26  ;;  %s1006_s28 = sand.u32 1, %s894_s14  }
  0x17   : > { %s184_s29 = sand.u32 1, %s906_s17   ;;  %s567_s30 = sshll.u32 %s1006_s28, 8 }
  0x18   : > { %p1012_p13 = pnand %p682_p12, %p981_p4  ;;  %s582_s5 = sshll.u32 %s902_s16, 12 }
  0x19   : > { %s1188_s1 = sld [smem:[#allocation15_spill]]  ;;  %s188_s9 = scalar_lea.vmem [#allocation5], %s567_s30 }
  0x1a   : > { %s195_s10 = sshll.u32 %s188_s9, 4  ;;  %s1020_s11 = scalar_lea.sflag [#allocation6], %s184_s29  ;;  %s196_s10 = int_to_ptr.vmem [resolvable:$true] %s195_s10 }
  0x1b   : > { %p740_p0 = pneg %p1012_p13  ;;  %s751_s19 = scalar_lea.vmem %s196_s10, 4096 }
  0x1c   : > { %p752_p1 = scmp.ne.s32.totalorder %s196_s10, %s751_s19  ;;  %s908_s21 = smov [#allocation5]  }
  0x1d   : > { %s756_s22 = sshll.u32 %s908_s21, 4  ;;  %s757_s22 = int_to_ptr.vmem [resolvable:$false] %s756_s22 }
  0x1e   : > { %p754_p2 = pnand %p752_p1, %p740_p0  ;;  %s758_s23 = scalar_lea.vmem %s757_s22, 8192 }
  0x1f   : > { %s194_s8 = scalar_lea.hbm %s1188_s1, %s582_s5  ;;  %p759_p4 = scmp.lt.s32.totalorder %s196_s10, %s757_s22 }
  0x20   : > { %p755_p3 = pneg %p754_p2  ;;  %p760_p5 = scmp.lt.s32.totalorder %s758_s23, %s751_s19 }
  0x22   : > { %p761_p6 = por %p760_p5, %p759_p4 }
  0x24   : > { %p762_p7 = pnand %p761_p6, %p755_p3 }
  0x26   : > { %765 = shalt.err (!%p762_p7)
}
  0x27   : > { %s909_s30 = smov 128   ;;  %s910_s29 = smov 8  }
  0x28   : > { %674 = dma.hbm_to_vmem [thread:$0]  (!%p1012_p13), %s194_s8, 4096, %s196_s10, %s1020_s11, %s909_s30, %s909_s30, %s910_s29  }
  0x29   : > { %p571_p10 = scmp.ge.s32.totalorder %s906_s17, 1  ;;  %p220_p12 = scmp.lt.s32.totalorder %s906_s17, 5 }
  0x2a   : > { %s564_s6 = sshll.u32 %s1006_s28, 6  ;;  %s581_s7 = sshll.u32 %s902_s16, 10 }
  0x2b   : > { %p1032_p1 = pnand %p571_p10, %p220_p12  ;;  %s1190_s0 = sld [smem:[#allocation14_spill]] }
  0x2c   : > { %s164_s22 = scalar_lea.vmem [#allocation2], %s564_s6  ;;  %s161_s1 = scalar_lea.sflag [#allocation3], %s1006_s28 }
  0x2d   : > { %s174_s23 = sshll.u32 %s164_s22, 4  ;;  %s911_s8 = smov [#allocation2]   ;;  %s175_s23 = int_to_ptr.vmem [resolvable:$true] %s174_s23 }
  0x2e   : > { %s779_s20 = scalar_lea.vmem %s175_s23, 1024  ;;  %s784_s10 = sshll.u32 %s911_s8, 4  ;;  %s785_s10 = int_to_ptr.vmem [resolvable:$false] %s784_s10 }
  0x2f   : > { %p780_p2 = scmp.ne.s32.totalorder %s175_s23, %s779_s20  ;;  %s786_s30 = scalar_lea.vmem %s785_s10, 2048 }
  0x30   : > { %p787_p5 = scmp.lt.s32.totalorder %s175_s23, %s785_s10  ;;  %p788_p6 = scmp.lt.s32.totalorder %s786_s30, %s779_s20 }
  0x31   : > { %s173_s21 = scalar_lea.hbm %s1190_s0, %s581_s7  ;;  %p782_p3 = pnand %p780_p2, %p740_p0 }
  0x32   : > { %p789_p7 = por %p788_p6, %p787_p5 }
  0x33   : > { %p783_p4 = pneg %p782_p3 }
  0x35   : > { %p790_p10 = pnand %p789_p7, %p783_p4 }
  0x37   : > { %793 = shalt.err (!%p790_p10)
}
  0x38   : > { %s912_s29 = smov 256   ;;  %s913_s6 = smov 16  }
  0x39   : > { %671 = dma.hbm_to_vmem [thread:$0]  (!%p1012_p13), %s173_s21, 1024, %s175_s23, %s161_s1, %s912_s29, %s912_s29, %s913_s6  }
  0x3a   : > { %s570_s7 = sshll.u32 %s902_s16, 4  ;;  %s208_s8 = scalar_lea.vmem [#allocation7], %s1006_s28 }
  0x3b   : > { %s213_s22 = scalar_lea.hbm %s1176_s2, %s570_s7  ;;  %s215_s0 = sshll.u32 %s208_s8, 4  ;;  %s216_s0 = int_to_ptr.vmem [resolvable:$true] %s215_s0 }
  0x3c   : > { %s807_s20 = scalar_lea.vmem %s216_s0, 16  ;;  %s914_s10 = smov [#allocation7]  }
  0x3d   : > { %p808_p12 = scmp.ne.s32.totalorder %s216_s0, %s807_s20  ;;  %s812_s30 = sshll.u32 %s914_s10, 4  ;;  %s813_s30 = int_to_ptr.vmem [resolvable:$false] %s812_s30 }
  0x3e   : > { %s814_s26 = scalar_lea.vmem %s813_s30, 32  ;;  %p815_p4 = scmp.lt.s32.totalorder %s216_s0, %s813_s30 }
  0x3f   : > { %p810_p2 = pnand %p808_p12, %p740_p0  ;;  %p816_p5 = scmp.lt.s32.totalorder %s814_s26, %s807_s20 }
  0x41   : > { %p811_p3 = pneg %p810_p2  ;;  %p817_p6 = por %p816_p5, %p815_p4 }
  0x43   : > { %p818_p7 = pnand %p817_p6, %p811_p3 }
  0x45   : > { %821 = shalt.err (!%p818_p7)
}
  0x46   : > { %677 = dma.hbm_to_vmem [thread:$0]  (!%p1012_p13), %s213_s22, 16, %s216_s0, %s1020_s11  }
  0x47   : > { %224 = sbr.rel (%p1032_p1) target bundleno = 331 (0x14b), region = 32  ;;  %s1061_s1 = sand.u32 (!%p1032_p1), 1, %s890_s13  }
  0x48   : > { %s572_s28 = sshll.u32 (!%p1032_p1), %s1061_s1, 6  ;;  %s227_s21 = scalar_lea.sflag (!%p1032_p1), [#allocation3], %s1061_s1 }
  0x49   : > { %s1065_s23 = scalar_lea.vmem (!%p1032_p1), [#allocation2], %s572_s28 }
  0x4c   : > { %873 = dma.done.wait (%p989_p8), %s227_s21, 1024  }
  0x4d   : > { %875 = vsyncadd (%p989_p8), %s227_s21, 4294966272  ;;  %s235_s0 = sand.u32 1, %s969_s18   ;;  %s573_s26 = sshll.u32 %s1061_s1, 8 }
  0x4e   : > { %s236_s4 = scalar_lea.sflag [#allocation6], %s235_s0  ;;  %s1073_s11 = scalar_lea.vmem [#allocation5], %s573_s26 }
  0x4f   : > { %877 = dma.done.wait (%p989_p8), %s236_s4, 4112  }
  0x50   : > { %879 = vsyncadd (%p989_p8), %s236_s4, 4294963184  ;;  %v320_v0 = vld [vmem:[%s1073_s11 + $0xf8] sm:$0xff]  ;;  %v319_v2 = vld [vmem:[%s1073_s11 + $0xf0] sm:$0xff]  ;;  %s574_s18 = sshll.u32 %s1061_s1, 5  ;;  %s247_s24 = scalar_lea.vmem [#allocation7], %s1061_s1 }
  0x51   : > { %v304_v1 = vld [vmem:[%s1073_s11 + $0x78] sm:$0xff]  ;;  %584 = vmatprep.subr.mxu0 %v320_v0  ;;  %628 = vmatprep.subr.mxu1 %v320_v0  ;;  %v303_v3 = vld [vmem:[%s1073_s11 + $0x70] sm:$0xff]  ;;  %v318_v4 = vld [vmem:[%s1073_s11 + $0xe8] sm:$0xff]  ;;  %s278_s5 = scalar_lea.vmem [#allocation8], %s574_s18  ;;  %s583_s6 = sshll.u32 %s898_s15, 9 }
  0x52   : > { %585 = vmatpush3.msra.mxu0 %v304_v1  ;;  %644 = vmatpush3.msra.mxu1 %v304_v1  ;;  %v302_v5 = vld [vmem:[%s1073_s11 + $0x68] sm:$0xff]  ;;  %v317_v6 = vld [vmem:[%s1073_s11 + $0xe0] sm:$0xff]  ;;  %v316_v8 = vld [vmem:[%s1073_s11 + $0xd8] sm:$0xff]  ;;  %s433_s29 = sshll.u32 %s278_s5, 4  ;;  %s1127_s19 = scalar_lea.hbm %s1177_s3, %s583_s6  ;;  %s1122_s29 = int_to_ptr.vmem [resolvable:$true] %s433_s29 }
  0x53   : > { %586 = vmatprep.subr.mxu0 %v319_v2  ;;  %629 = vmatprep.subr.mxu1 %v319_v2  ;;  %v301_v7 = vld [vmem:[%s1073_s11 + $0x60] sm:$0xff]  ;;  %v300_v9 = vld [vmem:[%s1073_s11 + $0x58] sm:$0xff]  ;;  %v315_v10 = vld [vmem:[%s1073_s11 + $0xd0] sm:$0xff]  ;;  %s418_s15 = scalar_lea.sflag [#allocation4], %s1061_s1  ;;  %s822_s22 = scalar_lea.vmem %s1122_s29, 512 }
  0x54   : > { %587 = vmatpush3.msra.mxu0 %v303_v3  ;;  %645 = vmatpush3.msra.mxu1 %v303_v3  ;;  %v299_v11 = vld [vmem:[%s1073_s11 + $0x50] sm:$0xff]  ;;  %v314_v12 = vld [vmem:[%s1073_s11 + $0xc8] sm:$0xff]  ;;  %v313_v14 = vld [vmem:[%s1073_s11 + $0xc0] sm:$0xff]  ;;  %p823_p8 = scmp.ne.s32.totalorder %s1122_s29, %s822_s22  ;;  %s915_s8 = smov [#allocation8]  }
  0x55   : > { %588 = vmatprep.subr.mxu0 %v318_v4  ;;  %630 = vmatprep.subr.mxu1 %v318_v4  ;;  %v298_v13 = vld [vmem:[%s1073_s11 + $0x48] sm:$0xff]  ;;  %v297_v15 = vld [vmem:[%s1073_s11 + $0x40] sm:$0xff]  ;;  %v312_v16 = vld [vmem:[%s1073_s11 + $0xb8] sm:$0xff]  ;;  %s826_s20 = sshll.u32 %s915_s8, 4  ;;  %s827_s20 = int_to_ptr.vmem [resolvable:$false] %s826_s20 }
  0x56   : > { %589 = vmatpush3.msra.mxu0 %v302_v5  ;;  %646 = vmatpush3.msra.mxu1 %v302_v5  ;;  %v296_v17 = vld [vmem:[%s1073_s11 + $0x38] sm:$0xff]  ;;  %v311_v18 = vld [vmem:[%s1073_s11 + $0xb0] sm:$0xff]  ;;  %v310_v20 = vld [vmem:[%s1073_s11 + $0xa8] sm:$0xff]  ;;  %p824_p13 = pnand %p823_p8, %p993_p9  ;;  %s828_s10 = scalar_lea.vmem %s827_s20, 1024 }
  0x57   : > { %590 = vmatprep.subr.mxu0 %v317_v6  ;;  %631 = vmatprep.subr.mxu1 %v317_v6  ;;  %v295_v19 = vld [vmem:[%s1073_s11 + $0x30] sm:$0xff]  ;;  %v294_v21 = vld [vmem:[%s1073_s11 + $0x28] sm:$0xff]  ;;  %v309_v22 = vld [vmem:[%s1073_s11 + $0xa0] sm:$0xff]  ;;  %p829_p1 = scmp.lt.s32.totalorder %s1122_s29, %s827_s20  ;;  %p830_p10 = scmp.lt.s32.totalorder %s828_s10, %s822_s22 }
  0x58   : > { %591 = vmatpush3.msra.mxu0 %v301_v7  ;;  %647 = vmatpush3.msra.mxu1 %v301_v7  ;;  %v293_v23 = vld [vmem:[%s1073_s11 + $0x20] sm:$0xff]  ;;  %v308_v24 = vld [vmem:[%s1073_s11 + $0x98] sm:$0xff]  ;;  %v307_v26 = vld [vmem:[%s1073_s11 + $0x90] sm:$0xff]  ;;  %p825_p0 = pneg %p824_p13 }
  0x59   : > { %592 = vmatprep.subr.mxu0 %v316_v8  ;;  %632 = vmatprep.subr.mxu1 %v316_v8  ;;  %v292_v25 = vld [vmem:[%s1073_s11 + $0x18] sm:$0xff]  ;;  %v291_v27 = vld [vmem:[%s1073_s11 + $0x10] sm:$0xff]  ;;  %v306_v28 = vld [vmem:[%s1073_s11 + $0x88] sm:$0xff]  ;;  %p831_p12 = por %p830_p10, %p829_p1 }
  0x5a   : > { %593 = vmatpush3.msra.mxu0 %v300_v9  ;;  %648 = vmatpush3.msra.mxu1 %v300_v9  ;;  %v290_v29 = vld [vmem:[%s1073_s11 + $0x8] sm:$0xff]  ;;  %v305_v30 = vld [vmem:[%s1073_s11 + $0x80] sm:$0xff]  ;;  %v284_v36 = vld [vmem:[%s1065_s23 + $0x18] sm:$0xff] }
  0x5b   : > { %594 = vmatprep.subr.mxu0 %v315_v10  ;;  %633 = vmatprep.subr.mxu1 %v315_v10  ;;  %v289_v31 = vld [vmem:[%s1073_s11] sm:$0xff]  ;;  %v282_v32 = vld [vmem:[%s1065_s23 + $0x8] sm:$0xff]  ;;  %v288_v37 = vld [vmem:[%s1065_s23 + $0x38] sm:$0xff]  ;;  %p832_p2 = pnand %p831_p12, %p825_p0 }
  0x5c   : > { %595 = vmatpush3.msra.mxu0 %v299_v11  ;;  %649 = vmatpush3.msra.mxu1 %v299_v11  ;;  %v286_v33 = vld [vmem:[%s1065_s23 + $0x28] sm:$0xff]  ;;  %v281_v34 = vld [vmem:[%s1065_s23] sm:$0xff]  ;;  %v283_v38 = vld [vmem:[%s1065_s23 + $0x10] sm:$0xff] }
  0x5d   : > { %596 = vmatprep.subr.mxu0 %v314_v12  ;;  %634 = vmatprep.subr.mxu1 %v314_v12  ;;  %v285_v35 = vld [vmem:[%s1065_s23 + $0x20] sm:$0xff]  ;;  %v287_v39 = vld [vmem:[%s1065_s23 + $0x30] sm:$0xff] }
  0x5e   : > { %597 = vmatpush3.msra.mxu0 %v298_v13  ;;  %650 = vmatpush3.msra.mxu1 %v298_v13  ;;  %v575_v42 = vld [vmem:[%s247_s24] ss:$0 sm:$0xff] }
  0x5f   : > { %598 = vmatprep.subr.mxu0 %v313_v14  ;;  %635 = vmatprep.subr.mxu1 %v313_v14 }
  0x60   : > { %599 = vmatpush3.msra.mxu0 %v297_v15  ;;  %651 = vmatpush3.msra.mxu1 %v297_v15 }
  0x61   : > { %600 = vmatprep.subr.mxu0 %v312_v16  ;;  %636 = vmatprep.subr.mxu1 %v312_v16 }
  0x62   : > { %601 = vmatpush3.msra.mxu0 %v296_v17  ;;  %652 = vmatpush3.msra.mxu1 %v296_v17 }
  0x63   : > { %602 = vmatprep.subr.mxu0 %v311_v18  ;;  %637 = vmatprep.subr.mxu1 %v311_v18 }
  0x64   : > { %603 = vmatpush3.msra.mxu0 %v295_v19  ;;  %653 = vmatpush3.msra.mxu1 %v295_v19 }
  0x65   : > { %604 = vmatprep.subr.mxu0 %v310_v20  ;;  %638 = vmatprep.subr.mxu1 %v310_v20 }
  0x66   : > { %605 = vmatpush3.msra.mxu0 %v294_v21  ;;  %654 = vmatpush3.msra.mxu1 %v294_v21 }
  0x67   : > { %606 = vmatprep.subr.mxu0 %v309_v22  ;;  %639 = vmatprep.subr.mxu1 %v309_v22 }
  0x68   : > { %607 = vmatpush3.msra.mxu0 %v293_v23  ;;  %655 = vmatpush3.msra.mxu1 %v293_v23 }
  0x69   : > { %608 = vmatprep.subr.mxu0 %v308_v24  ;;  %640 = vmatprep.subr.mxu1 %v308_v24 }
  0x6a   : > { %609 = vmatpush3.msra.mxu0 %v292_v25  ;;  %656 = vmatpush3.msra.mxu1 %v292_v25 }
  0x6b   : > { %610 = vmatprep.subr.mxu0 %v307_v26  ;;  %641 = vmatprep.subr.mxu1 %v307_v26 }
  0x6c   : > { %611 = vmatpush3.msra.mxu0 %v291_v27  ;;  %657 = vmatpush3.msra.mxu1 %v291_v27 }
  0x6d   : > { %612 = vmatprep.subr.mxu0 %v306_v28  ;;  %642 = vmatprep.subr.mxu1 %v306_v28 }
  0x6e   : > { %613 = vmatpush3.msra.mxu0 %v290_v29  ;;  %658 = vmatpush3.msra.mxu1 %v290_v29 }
  0x6f   : > { %614 = vmatprep.subr.mxu0 %v305_v30  ;;  %643 = vmatprep.subr.mxu1 %v305_v30 }
  0x70   : > { %615 = vmatpush3.msra.mxu0 %v289_v31  ;;  %659 = vmatpush3.msra.mxu1 %v289_v31 }
  0x71   : > { %392 = vmatprep.mubr.f32.mxu0 %v282_v32  ;;  %402 = vmatprep.mubr.f32.mxu1 %v286_v33 }
  0x72   : > { %393 = vmatmul.mubr.f32.vlgmr.msra.gmra.mxu0 %v281_v34  ;;  %403 = vmatmul.mubr.f32.vlgmr.msra.gmra.mxu1 %v285_v35 }
  0x73   : > { %397 = vmatprep.mubr.f32.mxu0 %v284_v36  ;;  %407 = vmatprep.mubr.f32.mxu1 %v288_v37 }
  0x76   : > { %398 = vmatmul.mubr.f32.gmra.mxu0 %v283_v38  ;;  %408 = vmatmul.mubr.f32.gmra.mxu1 %v287_v39 }
 0x132   : > { %v616_v40 = vpop.f32.mrf.mxu0  ;;  %v622_v41 = vpop.f32.mrf.mxu1 }
 0x134   : > { %v617_v43 = vpop.f32.mrf.mxu0  ;;  %v623_v44 = vpop.f32.mrf.mxu1 }
 0x135   : > { %v618_v45 = vadd.f32 %v617_v43, %v616_v40  ;;  %v624_v46 = vadd.f32 %v623_v44, %v622_v41 }
 0x136   : > { %v619_v47 = vpop.f32.mrf.mxu0  ;;  %v625_v48 = vpop.f32.mrf.mxu1 }
 0x137   : > { %v395_v49 = vadd.f32 %v618_v45, %v575_v42  ;;  %v405_v50 = vadd.f32 %v624_v46, %v575_v42 }
 0x138   : > { %v620_v51 = vpop.f32.mrf.mxu0  ;;  %v626_v52 = vpop.f32.mrf.mxu1 }
 0x139   : > { %413 = vst [vmem:[%s278_s5] sm:$0xff] %v395_v49  ;;  %415 = vst [vmem:[%s278_s5 + $0x10] sm:$0xff] %v405_v50  ;;  %v621_v53 = vadd.f32 %v620_v51, %v619_v47  ;;  %v627_v54 = vadd.f32 %v626_v52, %v625_v48 }
 0x13b   : > { %v400_v55 = vadd.f32 %v621_v53, %v575_v42  ;;  %v410_v56 = vadd.f32 %v627_v54, %v575_v42 }
 0x13d   : > { %414 = vst [vmem:[%s278_s5 + $0x8] sm:$0xff] %v400_v55  ;;  %416 = vst [vmem:[%s278_s5 + $0x18] sm:$0xff] %v410_v56 }
 0x13e   : > { %835 = shalt.err (!%p832_p2)
}
 0x13f   : > { %s836_s30 = scalar_lea.hbm %s1127_s19, 512  ;;  %s840_s23 = scalar_lea.hbm %s1177_s3, 2048 }
 0x140   : > { %p837_p3 = scmp.ne.s32.totalorder %s1127_s19, %s836_s30  ;;  %p841_p6 = scmp.lt.s32.totalorder %s1127_s19, %s1177_s3 }
 0x141   : > { %p842_p7 = scmp.lt.s32.totalorder %s840_s23, %s836_s30 }
 0x142   : > { %p838_p4 = pnand %p837_p3, %p993_p9 }
 0x143   : > { %p843_p8 = por %p842_p7, %p841_p6 }
 0x144   : > { %p839_p5 = pneg %p838_p4 }
 0x146   : > { %p844_p13 = pnand %p843_p8, %p839_p5 }
 0x148   : > { %847 = shalt.err (!%p844_p13)
}
 0x149   : > { %s916_s4 = smov 128   ;;  %s917_s11 = smov 8  }
 0x14a   : > { %666 = dma.vmem_to_hbm [thread:$0]  (%p993_p9), %s1122_s29, 512, %s1127_s19, %s418_s15, %s916_s4, %s916_s4, %s917_s11  }
 0x14b PF: > { %p683_p0 = scmp.ge.s32.totalorder %s906_s17, 2  ;;  %s448_s18 = sand.u32 1, %s886_s12  }
 0x14c   : > { %s449_s24 = scalar_lea.sflag [#allocation4], %s448_s18 }
 0x14d   : > { %p679_p1 = pnand %p683_p0, %p1000_p11 }
 0x14f   : > { %p680_p10 = pneg %p679_p1 }
 0x151   : > { %881 = dma.done.wait (%p680_p10), %s449_s24, 512  }
 0x152   : > { %883 = vsyncadd (%p680_p10), %s449_s24, 4294966784  ;;  %s22_s17 = sadd.s32 1, %s906_s17   ;;  %s1191_s25 = sld [smem:[#allocation13_spill]] }
 0x153   : > { %p19_p12 = scmp.ge.s32.totalorder %s22_s17, 6   ;;  %s1192_s1 = sld [smem:[#allocation12_spill]] }
 0x154   : > { %s1193_s12 = smov %s890_s13  ;;  %s1194_s13 = smov %s894_s14 }
 0x155   : > { %s1196_s15 = smov %s902_s16  ;;  %21 = sbr.rel (!%p19_p12) target bundleno = 11 (0xb), region = 101 }
 0x158   : > { %s1195_s14 = smov %s1191_s25 }
 0x159   : > { %s1197_s16 = smov %s1192_s1 }
 0x15a   :  { %454 = vsyncpa [#allocation3], 1 }
 0x15b   :  { %456 = vsyncpa [#allocation3 + $0x1], 1 }
 0x15c   :  { %457 = vsyncpa [#allocation6], 1 }
 0x15d   :  { %459 = vsyncpa [#allocation6 + $0x1], 1 }
 0x15e   :  { %460 = vsyncpa [#allocation4], 1 }
 0x15f   :  { %462 = vsyncpa [#allocation4 + $0x1], 1 }

</bundles_post_ra>
